<compile_context>
chip_gen: v7x
topology: tpu7x:2x2x1
jax: 0.10.0
libtpu: 0.0.40
codegen_flags: <defaults>
</compile_context>

<pallas_src>
import jax
import jax.numpy as jnp
from jax.experimental import pallas as pl
from jax.experimental.pallas import tpu as pltpu


LANE = 128  # TPU vreg lane width; last dim of the slab


# ----------------------------- Pallas kernel -------------------------------

def _contrast_kernel(ab_ref, x_ref, o_ref):
    """o = clamp(alpha*x + beta, 0, 1) on one lane-dense (block_rows, 128) tile.

    HBM I/O is in the input's native dtype; arithmetic is in f32 registers.
    """
    alpha = ab_ref[0]                     # scalars from SMEM (f32)
    beta = ab_ref[1]
    y = x_ref[...].astype(jnp.float32) * alpha + beta
    o_ref[...] = jnp.clip(y, 0.0, 1.0).astype(o_ref.dtype)


# ------------------------------- wrapper ------------------------------------

def contrast_enhancement(x, alpha, beta, *, target_block_bytes=4 << 20):
    """clamp(alpha*x + beta, 0, 1) elementwise via a single fused Pallas call.

    Zero extra HBM copies when x.size is a multiple of 128 (the usual case for
    image tensors); otherwise only the <128-element tail goes through a tiny
    jnp epilogue.
    """
    if not jnp.issubdtype(x.dtype, jnp.floating):
        raise TypeError("contrast_enhancement expects a floating-point input "
                        f"(got {x.dtype}); the [0,1] clamp is meaningless for ints")

    orig_shape = x.shape
    dtype = x.dtype
    n = x.size

    ab = jnp.stack([jnp.asarray(alpha, jnp.float32),
                    jnp.asarray(beta, jnp.float32)])      # (2,) scalars -> SMEM

    flat = x.reshape(-1)                  # contiguous reshape: no HBM copy
    rows = n // LANE                      # lane-dense rows seen by the kernel
    n_main = rows * LANE
    tail = n - n_main                     # < 128 ragged elements (jnp epilogue)

    pieces = []

    if rows > 0:
        itemsize = jnp.dtype(dtype).itemsize
        # Sublane packing multiple for the dtype: 8 (f32), 16 (bf16/f16).
        sub = 8 * max(1, 4 // itemsize)
        # ~4 MiB blocks: amortizes the ~0.35 us/step overhead on all gens.
        block_rows = max(sub,
                         (target_block_bytes // (LANE * itemsize)) // sub * sub)
        if rows <= block_rows:
            block_rows = rows             # single full-extent block (always legal)
        grid = (pl.cdiv(rows, block_rows),)   # partial last block auto-masked

        x2d = (flat if tail == 0 else flat[:n_main]).reshape(rows, LANE)

        out2d = pl.pallas_call(
            _contrast_kernel,
            out_shape=jax.ShapeDtypeStruct((rows, LANE), dtype),
            grid=grid,
            in_specs=[
                pl.BlockSpec(memory_space=pltpu.MemorySpace.SMEM),   # (alpha, beta)
                pl.BlockSpec((block_rows, LANE), lambda i: (i, 0)),  # input tile
            ],
            out_specs=pl.BlockSpec((block_rows, LANE), lambda i: (i, 0)),
            compiler_params=pltpu.CompilerParams(
                dimension_semantics=("parallel",),       # v7x megacore split
                vmem_limit_bytes=32 << 20,               # headroom for 4x4MiB bufs
            ),
        )(ab, x2d)
        pieces.append(out2d.reshape(-1))

    if tail:
        # Tiny ragged tail (< 128 elements) handled outside the kernel.
        t = flat[n_main:].astype(jnp.float32)
        pieces.append(jnp.clip(ab[0] * t + ab[1], 0.0, 1.0).astype(dtype))

    out_flat = pieces[0] if len(pieces) == 1 else jnp.concatenate(pieces)
    return out_flat.reshape(orig_shape)


# --------------------------------- main --------------------------------------

if __name__ == "__main__":
    key = jax.random.PRNGKey(0)
    x = jax.random.uniform(key, (2, 4, 16, 16), jnp.float32)   # NCHW in [0, 1]
    alpha = 1.5    # matches nn.Parameter(torch.tensor(1.5))
    beta = 0.0     # matches nn.Parameter(torch.tensor(0))

    # float32 path
    out = contrast_enhancement(x, alpha, beta)
    jax.block_until_ready(out)
    ref = jnp.clip(jnp.float32(alpha) * x + jnp.float32(beta), 0.0, 1.0)
    assert out.shape == x.shape and out.dtype == x.dtype
    assert bool(jnp.allclose(out, ref, atol=1e-6)), "f32 mismatch vs reference"

    # bfloat16 path (native-dtype HBM I/O, f32 register math)
    xb = x.astype(jnp.bfloat16)
    outb = contrast_enhancement(xb, alpha, beta)
    jax.block_until_ready(outb)
    refb = jnp.clip(jnp.float32(alpha) * xb.astype(jnp.float32) + jnp.float32(beta),
                    0.0, 1.0)
    assert outb.shape == xb.shape and outb.dtype == jnp.bfloat16
    assert bool(jnp.allclose(outb.astype(jnp.float32), refb, atol=1e-2)), \
        "bf16 mismatch vs reference"

    print("KERNEL_OK")
</pallas_src>

<mosaic_0001>
module attributes {stable_mosaic.version = 11 : i64} {
  func.func @_contrast_kernel(%arg0: i32, %arg1: memref<2xf32, #tpu.memory_space<smem>>, %arg2: memref<16x128xf32, #tpu.memory_space<vmem>>, %arg3: memref<16x128xf32, #tpu.memory_space<vmem>>) attributes {dimension_semantics = [#tpu.dimension_semantics<parallel>], iteration_bounds = array<i64: 1>, scalar_prefetch = 0 : i64, scratch_operands = 0 : i64, tpu.core_type = #tpu.core_type<tc>, window_params = [{transform_indices = @transform_0, window_bounds = array<i64: 2>}, {transform_indices = @transform_1, window_bounds = array<i64: 16, 128>}, {transform_indices = @transform_2, window_bounds = array<i64: 16, 128>}]} {
    %c0 = arith.constant 0 : index
    %0 = memref.load %arg1[%c0] : memref<2xf32, #tpu.memory_space<smem>>
    %c1 = arith.constant 1 : index
    %1 = memref.load %arg1[%c1] : memref<2xf32, #tpu.memory_space<smem>>
    %c0_0 = arith.constant 0 : index
    %c0_1 = arith.constant 0 : index
    %2 = vector.load %arg2[%c0_0, %c0_1] : memref<16x128xf32, #tpu.memory_space<vmem>>, vector<16x128xf32>
    %3 = vector.broadcast %0 : f32 to vector<16x128xf32>
    %4 = arith.mulf %2, %3 : vector<16x128xf32>
    %5 = vector.broadcast %1 : f32 to vector<16x128xf32>
    %6 = arith.addf %4, %5 : vector<16x128xf32>
    %cst = arith.constant 0.000000e+00 : f32
    %cst_2 = arith.constant 1.000000e+00 : f32
    %7 = vector.broadcast %cst : f32 to vector<16x128xf32>
    %8 = arith.maximumf %7, %6 : vector<16x128xf32>
    %9 = vector.broadcast %cst_2 : f32 to vector<16x128xf32>
    %10 = arith.minimumf %9, %8 : vector<16x128xf32>
    %c0_3 = arith.constant 0 : index
    %c0_4 = arith.constant 0 : index
    %11 = vector.load %arg3[%c0_3, %c0_4] : memref<16x128xf32, #tpu.memory_space<vmem>>, vector<16x128xf32>
    tpu.vector_store %arg3[%c0_3, %c0_4], %10 {strides = array<i32>} : memref<16x128xf32, #tpu.memory_space<vmem>>, vector<16x128xf32>,
    return
  }
  func.func @transform_0(%arg0: i32) -> i32 {
    %c0_i32 = arith.constant 0 : i32
    %c0_i32_0 = arith.constant 0 : i32
    return %c0_i32 : i32
  }
  func.func @transform_1(%arg0: i32) -> (i32, i32) {
    %c0_i32 = arith.constant 0 : i32
    %c0_i32_0 = arith.constant 0 : i32
    return %arg0, %c0_i32 : i32, i32
  }
  func.func @transform_2(%arg0: i32) -> (i32, i32) {
    %c0_i32 = arith.constant 0 : i32
    %c0_i32_0 = arith.constant 0 : i32
    return %arg0, %c0_i32 : i32, i32
  }
}

</mosaic_0001>

<bundles_post_ra>
// kernel: tpu_custom_call.1
= control target key start
LH: loop header
LB: loop body
LE: loop exit
PB: predicated region body
PF: predicated region fallthrough
CT: control target
= control target key end

     0   :  { %7 = vsyncpa [#allocation5], 0  ;;  %s199_s0 = inlined_call_operand.hbm [shape: f32[2], index: 0, kind: input, shape index: {}]   ;;  %s200_s1 = inlined_call_operand.hbm [shape: f32[16,128], index: 1, kind: input, shape index: {}]   ;;  %s201_s2 = inlined_call_operand.hbm [shape: f32[16,128], index: 2, kind: output, shape index: {}]  }
   0x1   :  { %8 = vsyncpa [#allocation3], 0 }
   0x2   :  { %9 = vsyncpa [#allocation4], 0  ;;  %s77_s11 = scalar_lea.hbm %s199_s0, 16 }
   0x3   :  { %p78_p0 = scmp.ne.s32.totalorder %s199_s0, %s77_s11  ;;  %p81_p1 = scmp.lt.u32.totalorder %s77_s11, %s199_s0 }
   0x5   :  { %p83_p2 = pnand %p81_p1, %p78_p0 }
   0x7   :  { %86 = shalt.err (!%p83_p2)
}
   0x8   :  { %s137_s16 = smov [#allocation2]   ;;  %s138_s19 = smov [#allocation6]  }
   0x9   :  { %17 = dma.hbm_to_smem %s199_s0, 16, %s137_s16, [#allocation5]  }
   0xa   :  { %s23_s20 = sshll.u32 %s138_s19, 4  ;;  %s87_s23 = scalar_lea.hbm %s200_s1, 256  ;;  %s24_s20 = int_to_ptr.vmem [resolvable:$true] %s23_s20 }
   0xb   :  { %p88_p3 = scmp.ne.s32.totalorder %s200_s1, %s87_s23  ;;  %p91_p4 = scmp.lt.u32.totalorder %s87_s23, %s200_s1 }
   0xd   :  { %p93_p5 = pnand %p91_p4, %p88_p3 }
   0xf   :  { %96 = shalt.err (!%p93_p5)
}
  0x10   :  { %s97_s28 = scalar_lea.vmem %s24_s20, 256  ;;  %p102_p7 = scmp.lt.s32.totalorder %s24_s20, %s24_s20 }
  0x11   :  { %p98_p6 = scmp.ne.s32.totalorder %s24_s20, %s97_s28  ;;  %p103_p8 = scmp.lt.s32.totalorder %s97_s28, %s97_s28 }
  0x13   :  { %p104_p9 = por %p103_p8, %p102_p7 }
  0x15   :  { %p105_p10 = pnand %p104_p9, %p98_p6 }
  0x17   :  { %108 = shalt.err (!%p105_p10)
}
  0x18   :  { %s139_s0 = smov 128   ;;  %s140_s29 = smov 8  }
  0x19   :  { %29 = dma.hbm_to_vmem [thread:$0]  %s200_s1, 256, %s24_s20, [#allocation3], %s139_s0, %s139_s0, %s140_s29  }
  0x1a   :  { %131 = dma.done.wait [#allocation5], 16  }
  0x1b   :  { %132 = vsyncadd [#allocation5], 4294967280 }
  0x1c   :  { %133 = dma.done.wait [#allocation3], 256  }
  0x1d   :  { %134 = vsyncadd [#allocation3], 4294967040 }
  0x1e   :  { %36 = sfence }
  0x1f   :  { %s37_s4 = sld [smem:[#allocation2]]  ;;  %s71_s5 = sld [smem:[#allocation2 + $0x1]]  ;;  %v39_v0 = vld [vmem:[#allocation6] sm:$0xff]  ;;  %v40_v1 = vld [vmem:[#allocation6 + $0x8] sm:$0xff] }
  0x20   :  { %s141_s6 = smov [#allocation7]  }
  0x21   :  { %s58_s7 = sshll.u32 %s141_s6, 4  ;;  %s59_s7 = int_to_ptr.vmem [resolvable:$true] %s58_s7 }
  0x22   :  { %s109_s1 = scalar_lea.vmem %s59_s7, 256  ;;  %p114_p12 = scmp.lt.s32.totalorder %s59_s7, %s59_s7 }
  0x23   :  { %p110_p11 = scmp.ne.s32.totalorder %s59_s7, %s109_s1  ;;  %p115_p13 = scmp.lt.s32.totalorder %s109_s1, %s109_s1 }
  0x25   :  { %v41_v2 = vstv %s37_s4  ;;  %v44_v3 = vstv %s71_s5  ;;  %p116_p0 = por %p115_p13, %p114_p12 }
  0x26   :  { %v42_v4 = vmul.f32 %v41_v2, %v39_v0  ;;  %v43_v5 = vmul.f32 %v41_v2, %v40_v1 }
  0x27   :  { %p117_p1 = pnand %p116_p0, %p110_p11 }
  0x28   :  { %v45_v6 = vadd.f32 %v44_v3, %v42_v4  ;;  %v46_v7 = vadd.f32 %v44_v3, %v43_v5 }
  0x2a   :  { %v47_v8 = vmax.f32 %v45_v6, 0.0  ;;  %v48_v9 = vmax.f32 %v46_v7, 0.0 }
  0x2c   :  { %v49_v10 = vmin.f32 %v47_v8, 1.0  ;;  %v50_v11 = vmin.f32 %v48_v9, 1.0 }
  0x2e   :  { %51 = vst [vmem:[#allocation7] sm:$0xff] %v49_v10  ;;  %52 = vst [vmem:[#allocation7 + $0x8] sm:$0xff] %v50_v11 }
  0x2f   :  { %120 = shalt.err (!%p117_p1)
}
  0x30   :  { %s121_s10 = scalar_lea.hbm %s201_s2, 256 }
  0x31   :  { %p122_p2 = scmp.ne.s32.totalorder %s201_s2, %s121_s10  ;;  %p125_p3 = scmp.lt.u32.totalorder %s121_s10, %s201_s2 }
  0x33   :  { %p127_p4 = pnand %p125_p3, %p122_p2 }
  0x35   :  { %130 = shalt.err (!%p127_p4)
}
  0x36   :  { %64 = dma.vmem_to_hbm [thread:$0]  %s59_s7, 256, %s201_s2, [#allocation4], %s139_s0, %s139_s0, %s140_s29  }
  0x37   :  { %135 = dma.done.wait [#allocation4], 256  }
  0x38   :  { %136 = vsyncadd [#allocation4], 4294967040 }
  0x39   :  { %68 = vsyncpa [#allocation3], 1 }
  0x3a   :  { %69 = vsyncpa [#allocation4], 1 }
  0x3b   :  { %70 = vsyncpa [#allocation5], 1 }

</bundles_post_ra>
